<compile_context>
chip_gen: v7x
topology: tpu7x:2x2x1
jax: 0.10.0
libtpu: 0.0.40
codegen_flags: <defaults>
</compile_context>

<pallas_src>
import functools

import jax
import jax.numpy as jnp
import numpy as np
from jax.experimental import pallas as pl
from jax.experimental.pallas import tpu as pltpu

CONFIG = {
    "n_conv_layers": 2,
    "filters": 4,
    "kernel_size": 3,
    "activation": "relu",
    "n_dense_layers": 2,
    "dense_size": 32,
    "output_shape": 3,
}
SEQ_LEN = 7      # module hard-codes size = 7
LANE = 128       # lane width for the hidden layers
MAX_TB = 2048    # max batch-tile rows (narrow in/out slabs -> tiny VMEM footprint)


def _round_up(x, m):
    return ((x + m - 1) // m) * m


def _apply_activation(h, activation):
    if activation == "relu":
        return jnp.maximum(h, 0.0)
    if activation == "tanh":
        return jnp.tanh(h)
    if activation == "sigmoid":
        return jax.nn.sigmoid(h)
    if activation is None:
        return h
    raise ValueError(f"Unknown activation function: {activation}")


# ----------------------------------------------------------------------------
# Fused forward kernel: whole network, one batch tile per grid step.
#   x_ref    : (tb, IN0_PAD)            narrow input tile
#   w0_ref   : (IN0_PAD, LANE)          first (Toeplitz-folded) layer weight
#   wmid_ref : (n_mid, LANE, LANE)      remaining hidden-layer weights, stacked
#   bh_ref   : (n_hidden, 1, LANE)      hidden-layer biases, stacked
#   wo_ref   : (LANE, OUT_PAD)          output Linear weight
#   bo_ref   : (1, OUT_PAD)             output Linear bias
#   o_ref    : (tb, OUT_PAD)            narrow output tile
# ----------------------------------------------------------------------------
def _fused_forward_kernel(x_ref, w0_ref, wmid_ref, bh_ref, wo_ref, bo_ref,
                          o_ref, *, n_mid, activation):
    h = jnp.dot(x_ref[...], w0_ref[...],
                preferred_element_type=jnp.float32) + bh_ref[0]
    h = _apply_activation(h, activation)
    for i in range(n_mid):                                   # static unroll (3 layers)
        h = jnp.dot(h, wmid_ref[i],
                    preferred_element_type=jnp.float32) + bh_ref[i + 1]
        h = _apply_activation(h, activation)
    out = jnp.dot(h, wo_ref[...],
                  preferred_element_type=jnp.float32) + bo_ref[...]
    o_ref[...] = out.astype(o_ref.dtype)


# ----------------------------------------------------------------------------
# Parameter init (deterministic, synthetic) — PyTorch-style uniform fan-in init.
# ----------------------------------------------------------------------------
def init_params(config, key):
    params = {"convs": [], "denses": []}
    in_ch = 1
    keys = jax.random.split(key, 16)
    ki = 0
    for _ in range(config["n_conv_layers"]):
        fan_in = in_ch * config["kernel_size"]
        bound = 1.0 / np.sqrt(fan_in)
        w = jax.random.uniform(
            keys[ki], (config["filters"], in_ch, config["kernel_size"]),
            minval=-bound, maxval=bound, dtype=jnp.float32)
        b = jax.random.uniform(
            keys[ki + 1], (config["filters"],), minval=-bound, maxval=bound,
            dtype=jnp.float32)
        params["convs"].append((w, b))
        in_ch = config["filters"]
        ki += 2

    size = SEQ_LEN
    for _ in range(config["n_conv_layers"]):
        size = size - config["kernel_size"] + 1
    flat = size * config["filters"]

    in_f = flat
    for _ in range(config["n_dense_layers"]):
        bound = 1.0 / np.sqrt(in_f)
        w = jax.random.uniform(keys[ki], (in_f, config["dense_size"]),
                               minval=-bound, maxval=bound, dtype=jnp.float32)
        b = jax.random.uniform(keys[ki + 1], (config["dense_size"],),
                               minval=-bound, maxval=bound, dtype=jnp.float32)
        params["denses"].append((w, b))
        in_f = config["dense_size"]
        ki += 2

    bound = 1.0 / np.sqrt(config["dense_size"])
    params["output"] = (
        jax.random.uniform(keys[ki], (config["dense_size"], config["output_shape"]),
                           minval=-bound, maxval=bound, dtype=jnp.float32),
        jax.random.uniform(keys[ki + 1], (config["output_shape"],),
                           minval=-bound, maxval=bound, dtype=jnp.float32),
    )
    return params


# ----------------------------------------------------------------------------
# Fold convs / flatten-order into plain matmul weights, padded & stacked.
# Done ONCE at setup time on the host (numpy), zero per-step cost.
# ----------------------------------------------------------------------------
def prepare_fused_params(params, config):
    act = config["activation"]

    # ---- Conv layers -> Toeplitz matmul weights on the NWC-flattened activation.
    mats = []                                   # unpadded (w, b) per hidden layer
    c_in, l_in = 1, SEQ_LEN
    for (w, b) in params["convs"]:
        w_np, b_np = np.asarray(w), np.asarray(b)
        c_out, _, k = w_np.shape
        l_out = l_in - k + 1
        w_big = np.zeros((l_in * c_in, l_out * c_out), np.float32)
        for l in range(l_out):
            for kk in range(k):
                w_big[(l + kk) * c_in:(l + kk + 1) * c_in,
                      l * c_out:(l + 1) * c_out] = w_np[:, :, kk].T   # (c_in, c_out)
        b_big = np.tile(b_np, l_out)                                  # (l, c) order
        mats.append((w_big, b_big))
        c_in, l_in = c_out, l_out

    # ---- First dense: permute rows so it consumes the NWC-flattened activation
    #      while matching PyTorch's channel-major (NCW) Flatten semantics.
    perm = np.array(
        [(j % c_in) * l_in + (j // c_in) for j in range(c_in * l_in)], dtype=np.int32)
    dense_mats = [(np.asarray(w), np.asarray(b)) for (w, b) in params["denses"]]
    w0d, b0d = dense_mats[0]
    dense_mats[0] = (w0d[perm, :], b0d)
    mats.extend(dense_mats)

    n_hidden = len(mats)
    assert n_hidden >= 2, "kernel expects at least 2 hidden layers"
    n_mid = n_hidden - 1

    # ---- Pad / stack.
    in0 = mats[0][0].shape[0]                           # real first-layer fan-in (=7)
    in0_pad = _round_up(in0, 8)                         # narrow input width (=8)

    w0 = np.zeros((in0_pad, LANE), np.float32)
    w0[:mats[0][0].shape[0], :mats[0][0].shape[1]] = mats[0][0]

    w_mid = np.zeros((n_mid, LANE, LANE), np.float32)
    for i in range(n_mid):
        wi = mats[i + 1][0]
        w_mid[i, :wi.shape[0], :wi.shape[1]] = wi

    b_h = np.zeros((n_hidden, 1, LANE), np.float32)
    for i in range(n_hidden):
        bi = mats[i][1]
        b_h[i, 0, :bi.shape[0]] = bi

    w_o_np = np.asarray(params["output"][0])
    b_o_np = np.asarray(params["output"][1])
    out_real = config["output_shape"]
    out_pad = _round_up(out_real, 8)                    # narrow output width (=8)
    w_o = np.zeros((LANE, out_pad), np.float32)
    w_o[:w_o_np.shape[0], :w_o_np.shape[1]] = w_o_np
    b_o = np.zeros((1, out_pad), np.float32)
    b_o[0, :out_real] = b_o_np

    return {
        "w0": jnp.asarray(w0),
        "w_mid": jnp.asarray(w_mid),
        "bh": jnp.asarray(b_h),
        "wo": jnp.asarray(w_o),
        "bo": jnp.asarray(b_o),
        "in0": in0,
        "in0_pad": in0_pad,
        "out_pad": out_pad,
        "n_mid": n_mid,
        "activation": act,
    }


# ----------------------------------------------------------------------------
# Fused forward pass: ONE pallas_call, batch-tiled grid.
# ----------------------------------------------------------------------------
def cnn_forward_fused(fparams, x, config):
    B = x.shape[0]
    x_flat = x.reshape(B, -1)                            # (B, 7): NWC flatten, C_in=1
    in0 = fparams["in0"]
    in0_pad = fparams["in0_pad"]
    out_pad = fparams["out_pad"]
    n_mid = fparams["n_mid"]
    n_hidden = n_mid + 1

    # Batch tile: big enough to amortize per-step overhead, >=2 grid steps once
    # B > 8 so v7x's two TensorCores both get work (no-op on v5e/v6e).
    tb = min(MAX_TB, max(8, _round_up(pl.cdiv(B, 2), 8)))
    b_pad = _round_up(B, tb)
    grid = (b_pad // tb,)

    # Narrow, zero-padded input slab (only 7 -> 8 lanes + batch rounding).
    x_pad = jnp.zeros((b_pad, in0_pad), jnp.float32).at[:B, :in0].set(x_flat)

    weight_bytes = 4 * (fparams["w0"].size + fparams["w_mid"].size +
                        fparams["bh"].size + fparams["wo"].size + fparams["bo"].size)
    io_bytes = 4 * b_pad * (in0_pad + out_pad)
    flops = 2 * b_pad * (in0_pad * LANE + n_mid * LANE * LANE + LANE * out_pad)

    kern = functools.partial(_fused_forward_kernel, n_mid=n_mid,
                             activation=fparams["activation"])
    out = pl.pallas_call(
        kern,
        out_shape=jax.ShapeDtypeStruct((b_pad, out_pad), jnp.float32),
        grid=grid,
        in_specs=[
            pl.BlockSpec((tb, in0_pad), lambda i: (i, 0)),          # x: batch tile
            pl.BlockSpec((in0_pad, LANE), lambda i: (0, 0)),        # w0: resident
            pl.BlockSpec((n_mid, LANE, LANE), lambda i: (0, 0, 0)),  # mid weights
            pl.BlockSpec((n_hidden, 1, LANE), lambda i: (0, 0, 0)),  # hidden biases
            pl.BlockSpec((LANE, out_pad), lambda i: (0, 0)),        # output weight
            pl.BlockSpec((1, out_pad), lambda i: (0, 0)),           # output bias
        ],
        out_specs=pl.BlockSpec((tb, out_pad), lambda i: (i, 0)),
        compiler_params=pltpu.CompilerParams(
            dimension_semantics=("parallel",),          # shard batch tiles across TCs
        ),
        cost_estimate=pl.CostEstimate(
            flops=flops, transcendentals=0,
            bytes_accessed=io_bytes + weight_bytes),
    )(x_pad, fparams["w0"], fparams["w_mid"], fparams["bh"],
      fparams["wo"], fparams["bo"])

    return out[:B, :config["output_shape"]]


# ----------------------------------------------------------------------------
# Pure-JAX reference (same math as the PyTorch module) for a sanity check.
# ----------------------------------------------------------------------------
def cnn_forward_ref(params, x, config):
    act_fn = {"relu": jax.nn.relu, "tanh": jnp.tanh, "sigmoid": jax.nn.sigmoid}[
        config["activation"]]
    h = x
    for (w, b) in params["convs"]:
        h = jax.lax.conv_general_dilated(
            h, w, window_strides=(1,), padding="VALID",
            dimension_numbers=("NCH", "OIH", "NCH")) + b[None, :, None]
        h = act_fn(h)
    h = h.reshape(h.shape[0], -1)                        # channel-major flatten (NCW)
    for (w, b) in params["denses"]:
        h = act_fn(h @ w + b)
    w_o, b_o = params["output"]
    return h @ w_o + b_o


if __name__ == "__main__":
    key = jax.random.PRNGKey(0)
    k_params, k_x = jax.random.split(key)
    params = init_params(CONFIG, k_params)

    B = 2
    x = jax.random.normal(k_x, (B, 1, SEQ_LEN), dtype=jnp.float32)

    fparams = prepare_fused_params(params, CONFIG)

    fwd = jax.jit(functools.partial(cnn_forward_fused, fparams, config=CONFIG))
    out = jax.block_until_ready(fwd(x))

    ref = jax.block_until_ready(cnn_forward_ref(params, x, CONFIG))
    assert out.shape == (B, CONFIG["output_shape"])
    np.testing.assert_allclose(np.asarray(out), np.asarray(ref), rtol=1e-5, atol=1e-5)

    print("KERNEL_OK")
</pallas_src>

<mosaic_0001>
module attributes {stable_mosaic.version = 11 : i64} {
  func.func @_fused_forward_kernel(%arg0: i32, %arg1: memref<8x8xf32, #tpu.memory_space<vmem>>, %arg2: memref<8x128xf32, #tpu.memory_space<vmem>>, %arg3: memref<3x128x128xf32, #tpu.memory_space<vmem>>, %arg4: memref<4x1x128xf32, #tpu.memory_space<vmem>>, %arg5: memref<128x8xf32, #tpu.memory_space<vmem>>, %arg6: memref<1x8xf32, #tpu.memory_space<vmem>>, %arg7: memref<8x8xf32, #tpu.memory_space<vmem>>) attributes {dimension_semantics = [#tpu.dimension_semantics<parallel>], iteration_bounds = array<i64: 1>, scalar_prefetch = 0 : i64, scratch_operands = 0 : i64, tpu.core_type = #tpu.core_type<tc>, window_params = [{transform_indices = @transform_0, window_bounds = array<i64: 8, 8>}, {pipeline_mode = #tpu.pipeline_mode<synchronous>, transform_indices = @transform_1, window_bounds = array<i64: 8, 128>}, {pipeline_mode = #tpu.pipeline_mode<synchronous>, transform_indices = @transform_2, window_bounds = array<i64: 3, 128, 128>}, {pipeline_mode = #tpu.pipeline_mode<synchronous>, transform_indices = @transform_3, window_bounds = array<i64: 4, 1, 128>}, {pipeline_mode = #tpu.pipeline_mode<synchronous>, transform_indices = @transform_4, window_bounds = array<i64: 128, 8>}, {pipeline_mode = #tpu.pipeline_mode<synchronous>, transform_indices = @transform_5, window_bounds = array<i64: 1, 8>}, {transform_indices = @transform_6, window_bounds = array<i64: 8, 8>}]} {
    %c0 = arith.constant 0 : index
    %c0_0 = arith.constant 0 : index
    %0 = vector.load %arg1[%c0, %c0_0] : memref<8x8xf32, #tpu.memory_space<vmem>>, vector<8x8xf32>
    %c0_1 = arith.constant 0 : index
    %c0_2 = arith.constant 0 : index
    %1 = vector.load %arg2[%c0_1, %c0_2] : memref<8x128xf32, #tpu.memory_space<vmem>>, vector<8x128xf32>
    %cst = arith.constant dense<0.000000e+00> : vector<8x128xf32>
    %2 = tpu.matmul %0, %1, %cst {dimension_numbers = #tpu.dot_dimension_numbers<[1], [0], [0], [1], [0, 0, 1, 1], [], []>} : vector<8x8xf32>, vector<8x128xf32>, vector<8x128xf32> -> vector<8x128xf32>
    %c0_3 = arith.constant 0 : index
    %c0_4 = arith.constant 0 : index
    %c0_5 = arith.constant 0 : index
    %3 = vector.load %arg4[%c0_3, %c0_4, %c0_5] : memref<4x1x128xf32, #tpu.memory_space<vmem>>, vector<1x1x128xf32>
    %4 = vector.shape_cast %3 : vector<1x1x128xf32> to vector<1x128xf32>
    %5 = vector.broadcast %4 : vector<1x128xf32> to vector<8x128xf32>
    %6 = arith.addf %2, %5 : vector<8x128xf32>
    %cst_6 = arith.constant 0.000000e+00 : f32
    %7 = vector.broadcast %cst_6 : f32 to vector<8x128xf32>
    %8 = arith.maximumf %6, %7 : vector<8x128xf32>
    %c0_7 = arith.constant 0 : index
    %c0_8 = arith.constant 0 : index
    %c0_9 = arith.constant 0 : index
    %9 = vector.load %arg3[%c0_7, %c0_8, %c0_9] : memref<3x128x128xf32, #tpu.memory_space<vmem>>, vector<1x128x128xf32>
    %10 = vector.shape_cast %9 : vector<1x128x128xf32> to vector<128x128xf32>
    %cst_10 = arith.constant dense<0.000000e+00> : vector<8x128xf32>
    %11 = tpu.matmul %8, %10, %cst_10 {dimension_numbers = #tpu.dot_dimension_numbers<[1], [0], [0], [1], [0, 0, 1, 1], [], []>} : vector<8x128xf32>, vector<128x128xf32>, vector<8x128xf32> -> vector<8x128xf32>
    %c1 = arith.constant 1 : index
    %c0_11 = arith.constant 0 : index
    %c0_12 = arith.constant 0 : index
    %12 = vector.load %arg4[%c1, %c0_11, %c0_12] : memref<4x1x128xf32, #tpu.memory_space<vmem>>, vector<1x1x128xf32>
    %13 = vector.shape_cast %12 : vector<1x1x128xf32> to vector<1x128xf32>
    %14 = vector.broadcast %13 : vector<1x128xf32> to vector<8x128xf32>
    %15 = arith.addf %11, %14 : vector<8x128xf32>
    %cst_13 = arith.constant 0.000000e+00 : f32
    %16 = vector.broadcast %cst_13 : f32 to vector<8x128xf32>
    %17 = arith.maximumf %15, %16 : vector<8x128xf32>
    %c1_14 = arith.constant 1 : index
    %c0_15 = arith.constant 0 : index
    %c0_16 = arith.constant 0 : index
    %18 = vector.load %arg3[%c1_14, %c0_15, %c0_16] : memref<3x128x128xf32, #tpu.memory_space<vmem>>, vector<1x128x128xf32>
    %19 = vector.shape_cast %18 : vector<1x128x128xf32> to vector<128x128xf32>
    %cst_17 = arith.constant dense<0.000000e+00> : vector<8x128xf32>
    %20 = tpu.matmul %17, %19, %cst_17 {dimension_numbers = #tpu.dot_dimension_numbers<[1], [0], [0], [1], [0, 0, 1, 1], [], []>} : vector<8x128xf32>, vector<128x128xf32>, vector<8x128xf32> -> vector<8x128xf32>
    %c2 = arith.constant 2 : index
    %c0_18 = arith.constant 0 : index
    %c0_19 = arith.constant 0 : index
    %21 = vector.load %arg4[%c2, %c0_18, %c0_19] : memref<4x1x128xf32, #tpu.memory_space<vmem>>, vector<1x1x128xf32>
    %22 = vector.shape_cast %21 : vector<1x1x128xf32> to vector<1x128xf32>
    %23 = vector.broadcast %22 : vector<1x128xf32> to vector<8x128xf32>
    %24 = arith.addf %20, %23 : vector<8x128xf32>
    %cst_20 = arith.constant 0.000000e+00 : f32
    %25 = vector.broadcast %cst_20 : f32 to vector<8x128xf32>
    %26 = arith.maximumf %24, %25 : vector<8x128xf32>
    %c2_21 = arith.constant 2 : index
    %c0_22 = arith.constant 0 : index
    %c0_23 = arith.constant 0 : index
    %27 = vector.load %arg3[%c2_21, %c0_22, %c0_23] : memref<3x128x128xf32, #tpu.memory_space<vmem>>, vector<1x128x128xf32>
    %28 = vector.shape_cast %27 : vector<1x128x128xf32> to vector<128x128xf32>
    %cst_24 = arith.constant dense<0.000000e+00> : vector<8x128xf32>
    %29 = tpu.matmul %26, %28, %cst_24 {dimension_numbers = #tpu.dot_dimension_numbers<[1], [0], [0], [1], [0, 0, 1, 1], [], []>} : vector<8x128xf32>, vector<128x128xf32>, vector<8x128xf32> -> vector<8x128xf32>
    %c3 = arith.constant 3 : index
    %c0_25 = arith.constant 0 : index
    %c0_26 = arith.constant 0 : index
    %30 = vector.load %arg4[%c3, %c0_25, %c0_26] : memref<4x1x128xf32, #tpu.memory_space<vmem>>, vector<1x1x128xf32>
    %31 = vector.shape_cast %30 : vector<1x1x128xf32> to vector<1x128xf32>
    %32 = vector.broadcast %31 : vector<1x128xf32> to vector<8x128xf32>
    %33 = arith.addf %29, %32 : vector<8x128xf32>
    %cst_27 = arith.constant 0.000000e+00 : f32
    %34 = vector.broadcast %cst_27 : f32 to vector<8x128xf32>
    %35 = arith.maximumf %33, %34 : vector<8x128xf32>
    %c0_28 = arith.constant 0 : index
    %c0_29 = arith.constant 0 : index
    %36 = vector.load %arg5[%c0_28, %c0_29] : memref<128x8xf32, #tpu.memory_space<vmem>>, vector<128x8xf32>
    %cst_30 = arith.constant dense<0.000000e+00> : vector<8x8xf32>
    %37 = tpu.matmul %35, %36, %cst_30 {dimension_numbers = #tpu.dot_dimension_numbers<[1], [0], [0], [1], [0, 0, 1, 1], [], []>} : vector<8x128xf32>, vector<128x8xf32>, vector<8x8xf32> -> vector<8x8xf32>
    %c0_31 = arith.constant 0 : index
    %c0_32 = arith.constant 0 : index
    %38 = vector.load %arg6[%c0_31, %c0_32] : memref<1x8xf32, #tpu.memory_space<vmem>>, vector<1x8xf32>
    %39 = vector.broadcast %38 : vector<1x8xf32> to vector<8x8xf32>
    %40 = arith.addf %37, %39 : vector<8x8xf32>
    %c0_33 = arith.constant 0 : index
    %c0_34 = arith.constant 0 : index
    %41 = vector.load %arg7[%c0_33, %c0_34] : memref<8x8xf32, #tpu.memory_space<vmem>>, vector<8x8xf32>
    tpu.vector_store %arg7[%c0_33, %c0_34], %40 {strides = array<i32>} : memref<8x8xf32, #tpu.memory_space<vmem>>, vector<8x8xf32>,
    return
  }
  func.func @transform_0(%arg0: i32) -> (i32, i32) {
    %c0_i32 = arith.constant 0 : i32
    %c0_i32_0 = arith.constant 0 : i32
    return %arg0, %c0_i32 : i32, i32
  }
  func.func @transform_1(%arg0: i32) -> (i32, i32) {
    %c0_i32 = arith.constant 0 : i32
    %c0_i32_0 = arith.constant 0 : i32
    %c0_i32_1 = arith.constant 0 : i32
    return %c0_i32, %c0_i32_0 : i32, i32
  }
  func.func @transform_2(%arg0: i32) -> (i32, i32, i32) {
    %c0_i32 = arith.constant 0 : i32
    %c0_i32_0 = arith.constant 0 : i32
    %c0_i32_1 = arith.constant 0 : i32
    %c0_i32_2 = arith.constant 0 : i32
    return %c0_i32, %c0_i32_0, %c0_i32_1 : i32, i32, i32
  }
  func.func @transform_3(%arg0: i32) -> (i32, i32, i32) {
    %c0_i32 = arith.constant 0 : i32
    %c0_i32_0 = arith.constant 0 : i32
    %c0_i32_1 = arith.constant 0 : i32
    %c0_i32_2 = arith.constant 0 : i32
    return %c0_i32, %c0_i32_0, %c0_i32_1 : i32, i32, i32
  }
  func.func @transform_4(%arg0: i32) -> (i32, i32) {
    %c0_i32 = arith.constant 0 : i32
    %c0_i32_0 = arith.constant 0 : i32
    %c0_i32_1 = arith.constant 0 : i32
    return %c0_i32, %c0_i32_0 : i32, i32
  }
  func.func @transform_5(%arg0: i32) -> (i32, i32) {
    %c0_i32 = arith.constant 0 : i32
    %c0_i32_0 = arith.constant 0 : i32
    %c0_i32_1 = arith.constant 0 : i32
    return %c0_i32, %c0_i32_0 : i32, i32
  }
  func.func @transform_6(%arg0: i32) -> (i32, i32) {
    %c0_i32 = arith.constant 0 : i32
    %c0_i32_0 = arith.constant 0 : i32
    return %arg0, %c0_i32 : i32, i32
  }
}

</mosaic_0001>

<bundles_post_ra>
// kernel: cnn_forward_fused.1
= control target key start
LH: loop header
LB: loop body
LE: loop exit
PB: predicated region body
PF: predicated region fallthrough
CT: control target
= control target key end

     0   :  { %11 = vsyncpa [#allocation3], 0  ;;  %s1032_s0 = inlined_call_operand.vmem [shape: f32[8,8], index: 0, kind: input, shape index: {}]   ;;  %s1033_s1 = inlined_call_operand.vmem [shape: f32[8,128], index: 1, kind: input, shape index: {}]   ;;  %s1034_s2 = inlined_call_operand.hbm [shape: f32[3,128,128], index: 2, kind: input, shape index: {}]   ;;  %s1035_s3 = inlined_call_operand.vmem [shape: f32[4,1,128], index: 3, kind: input, shape index: {}]   ;;  %s1036_s4 = inlined_call_operand.hbm [shape: f32[128,8], index: 4, kind: input, shape index: {}]   ;;  %s1037_s5 = inlined_call_operand.vmem [shape: f32[1,8], index: 5, kind: input, shape index: {}]   ;;  %s1038_s6 = inlined_call_operand.vmem [shape: f32[8,8], index: 6, kind: output, shape index: {}]  }
   0x1   :  { %12 = vsyncpa [#allocation5], 0  ;;  %s897_s21 = smov [#allocation2]   ;;  %s849_s25 = scalar_lea.hbm %s1034_s2, 6144 }
   0x2   :  { %s22_s22 = sshll.u32 %s897_s21, 4  ;;  %p850_p0 = scmp.ne.s32.totalorder %s1034_s2, %s849_s25  ;;  %s23_s22 = int_to_ptr.vmem [resolvable:$true] %s22_s22 }
   0x3   :  { %p853_p1 = scmp.lt.u32.totalorder %s849_s25, %s1034_s2 }
   0x5   :  { %p855_p2 = pnand %p853_p1, %p850_p0 }
   0x7   :  { %858 = shalt.err (!%p855_p2)
}
   0x8   :  { %s859_s30 = scalar_lea.vmem %s23_s22, 6144  ;;  %p864_p4 = scmp.lt.s32.totalorder %s23_s22, %s23_s22 }
   0x9   :  { %p860_p3 = scmp.ne.s32.totalorder %s23_s22, %s859_s30  ;;  %p865_p5 = scmp.lt.s32.totalorder %s859_s30, %s859_s30 }
   0xb   :  { %p866_p6 = por %p865_p5, %p864_p4 }
   0xd   :  { %p867_p7 = pnand %p866_p6, %p860_p3 }
   0xf   :  { %870 = shalt.err (!%p867_p7)
}
  0x10   :  { %s898_s7 = smov 128   ;;  %s899_s8 = smov 8  }
  0x11   :  { %28 = dma.hbm_to_vmem [thread:$0]  %s1034_s2, 6144, %s23_s22, [#allocation3], %s898_s7, %s898_s7, %s899_s8  }
  0x12   :  { %s900_s11 = smov [#allocation4]   ;;  %s871_s15 = scalar_lea.hbm %s1036_s4, 2048 }
  0x13   :  { %s36_s12 = sshll.u32 %s900_s11, 4  ;;  %p872_p8 = scmp.ne.s32.totalorder %s1036_s4, %s871_s15  ;;  %s37_s12 = int_to_ptr.vmem [resolvable:$true] %s36_s12 }
  0x14   :  { %p875_p9 = scmp.lt.u32.totalorder %s871_s15, %s1036_s4 }
  0x16   :  { %p877_p10 = pnand %p875_p9, %p872_p8 }
  0x18   :  { %880 = shalt.err (!%p877_p10)
}
  0x19   :  { %s881_s20 = scalar_lea.vmem %s37_s12, 2048  ;;  %p886_p12 = scmp.lt.s32.totalorder %s37_s12, %s37_s12 }
  0x1a   :  { %p882_p11 = scmp.ne.s32.totalorder %s37_s12, %s881_s20  ;;  %p887_p13 = scmp.lt.s32.totalorder %s881_s20, %s881_s20 }
  0x1c   :  { %p888_p0 = por %p887_p13, %p886_p12 }
  0x1e   :  { %p889_p1 = pnand %p888_p0, %p882_p11 }
  0x20   :  { %892 = shalt.err (!%p889_p1)
}
  0x21   :  { %42 = dma.hbm_to_vmem [thread:$0]  %s1036_s4, 2048, %s37_s12, [#allocation5], %s898_s7, %s898_s7, %s899_s8  }
  0x22   :  { %893 = dma.done.wait [#allocation3], 6144  }
  0x23   :  { %894 = vsyncadd [#allocation3], 4294961152 }
  0x24   :  { %895 = dma.done.wait [#allocation5], 2048  }
  0x25   :  { %896 = vsyncadd [#allocation5], 4294965248  ;;  %v901_v0 = vmov 0.0   ;;  %vm902_vm0 = vmmov 0   ;;  %v903_v1 = vmov 0.0|0.0   ;;  %vm60_vm1 = vcmask 64512  }
  0x26   :  { %601 = vmatprep.subr.mxu0 %v901_v0  ;;  %603 = vmatprep.mubr.msk.f32.mxu0 %vm902_vm0, %v901_v0  ;;  %v52_v2 = vld [vmem:[%s1033_s1] sm:$0xff]  ;;  %v136_v5 = vld [vmem:[#allocation2 + $0x8] sm:$0xff]  ;;  %v137_v6 = vld [vmem:[#allocation2 + $0x10] sm:$0xff] }
  0x27   :  { %746 = vmatprep.subr.bf16.mxu1 %v903_v1  ;;  %638 = vmatprep.mubr.msk.f32.mxu1 %vm902_vm0, %v901_v0  ;;  %v51_v3 = vld [vmem:[%s1032_s0] sm:$0xff]  ;;  %v138_v7 = vld [vmem:[#allocation2 + $0x18] sm:$0xff]  ;;  %v140_v11 = vld [vmem:[#allocation2 + $0x28] sm:$0xff] }
  0x28   :  { %v135_v4 = vld [vmem:[#allocation2] sm:$0xff]  ;;  %602 = vmatpush3.msra.mxu0 %v52_v2  ;;  %v750_v9 = vpack.c.bf16 %v138_v7, %v137_v6  ;;  %v141_v13 = vld [vmem:[#allocation2 + $0x30] sm:$0xff]  ;;  %v142_v14 = vld [vmem:[#allocation2 + $0x38] sm:$0xff] }
  0x29   :  { %604 = vmatmul.mubr.msk.f32.vlgmr.msra.gmra.mrb[0].mxu0 %vm60_vm1, %v51_v3  ;;  %v747_v8 = vpack.c.bf16 %v136_v5, %v135_v4  ;;  %770 = vmatprep.subr.bf16.mxu0 %v903_v1  ;;  %v139_v10 = vld [vmem:[#allocation2 + $0x20] sm:$0xff]  ;;  %v756_v15 = vpack.c.bf16 %v142_v14, %v141_v13  ;;  %v144_v17 = vld [vmem:[#allocation2 + $0x48] sm:$0xff]  ;;  %v145_v19 = vld [vmem:[#allocation2 + $0x50] sm:$0xff] }
  0x2a   :  { %673 = vmatprep.mubr.msk.f32.mxu0 %vm902_vm0, %v901_v0  ;;  %v753_v12 = vpack.c.bf16 %v140_v11, %v139_v10  ;;  %v143_v16 = vld [vmem:[#allocation2 + $0x40] sm:$0xff]  ;;  %v146_v20 = vld [vmem:[#allocation2 + $0x58] sm:$0xff]  ;;  %v148_v23 = vld [vmem:[#allocation2 + $0x68] sm:$0xff] }
  0x2b   :  { %748 = vmatpush3.bf16.msra.mxu1 %v747_v8  ;;  %v759_v18 = vpack.c.bf16 %v144_v17, %v143_v16  ;;  %v762_v21 = vpack.c.bf16 %v146_v20, %v145_v19  ;;  %v147_v22 = vld [vmem:[#allocation2 + $0x60] sm:$0xff]  ;;  %v149_v25 = vld [vmem:[#allocation2 + $0x70] sm:$0xff]  ;;  %v150_v26 = vld [vmem:[#allocation2 + $0x78] sm:$0xff] }
  0x2c   :  { %749 = vmatprep.subr.bf16.mxu1 %v903_v1  ;;  %v765_v24 = vpack.c.bf16 %v148_v23, %v147_v22  ;;  %v768_v27 = vpack.c.bf16 %v150_v26, %v149_v25  ;;  %v231_v28 = vld [vmem:[#allocation2 + $0x80] sm:$0xff]  ;;  %v232_v29 = vld [vmem:[#allocation2 + $0x88] sm:$0xff]  ;;  %v233_v30 = vld [vmem:[#allocation2 + $0x90] sm:$0xff] }
  0x2d   :  { %v771_v31 = vpack.c.bf16 %v232_v29, %v231_v28  ;;  %v234_v32 = vld [vmem:[#allocation2 + $0x98] sm:$0xff]  ;;  %v235_v34 = vld [vmem:[#allocation2 + $0xa0] sm:$0xff]  ;;  %v236_v35 = vld [vmem:[#allocation2 + $0xa8] sm:$0xff] }
  0x2e   :  { %v774_v33 = vpack.c.bf16 %v234_v32, %v233_v30  ;;  %v777_v36 = vpack.c.bf16 %v236_v35, %v235_v34  ;;  %v237_v37 = vld [vmem:[#allocation2 + $0xb0] sm:$0xff]  ;;  %v238_v38 = vld [vmem:[#allocation2 + $0xb8] sm:$0xff]  ;;  %v239_v40 = vld [vmem:[#allocation2 + $0xc0] sm:$0xff] }
  0x2f   :  { %751 = vmatpush3.bf16.msra.mxu1 %v750_v9  ;;  %772 = vmatpush3.bf16.msra.mxu0 %v771_v31  ;;  %v780_v39 = vpack.c.bf16 %v238_v38, %v237_v37  ;;  %v240_v41 = vld [vmem:[#allocation2 + $0xc8] sm:$0xff]  ;;  %v241_v43 = vld [vmem:[#allocation2 + $0xd0] sm:$0xff]  ;;  %v242_v44 = vld [vmem:[#allocation2 + $0xd8] sm:$0xff] }
  0x30   :  { %752 = vmatprep.subr.bf16.mxu1 %v903_v1  ;;  %773 = vmatprep.subr.bf16.mxu0 %v903_v1  ;;  %v783_v42 = vpack.c.bf16 %v240_v41, %v239_v40  ;;  %v786_v45 = vpack.c.bf16 %v242_v44, %v241_v43  ;;  %v243_v46 = vld [vmem:[#allocation2 + $0xe0] sm:$0xff]  ;;  %v244_v47 = vld [vmem:[#allocation2 + $0xe8] sm:$0xff]  ;;  %v245_v54 = vld [vmem:[#allocation2 + $0xf0] sm:$0xff] }
  0x31   :  { %v789_v48 = vpack.c.bf16 %v244_v47, %v243_v46  ;;  %v522_v49 = vld [vmem:[%s1035_s3] ss:$0 sm:$0xff]  ;;  %v246_v55 = vld [vmem:[#allocation2 + $0xf8] sm:$0xff]  ;;  %v328_v58 = vld [vmem:[#allocation2 + $0x108] sm:$0xff] }
  0x32   :  { %v792_v56 = vpack.c.bf16 %v246_v55, %v245_v54  ;;  %v327_v57 = vld [vmem:[#allocation2 + $0x100] sm:$0xff]  ;;  %v329_v59 = vld [vmem:[#allocation2 + $0x110] sm:$0xff]  ;;  %v330_v61 = vld [vmem:[#allocation2 + $0x118] sm:$0xff] }
  0x33   :  { %754 = vmatpush3.bf16.msra.mxu1 %v753_v12  ;;  %775 = vmatpush3.bf16.msra.mxu0 %v774_v33  ;;  %v795_v60 = vpack.c.bf16 %v328_v58, %v327_v57  ;;  %v798_v62 = vpack.c.bf16 %v330_v61, %v329_v59  ;;  %v331_v63 = vld [vmem:[#allocation2 + $0x120] sm:$0xff]  ;;  %v332_v2 = vld [vmem:[#allocation2 + $0x128] sm:$0xff]  ;;  %v333_v4 = vld [vmem:[#allocation2 + $0x130] sm:$0xff] }
  0x34   :  { %755 = vmatprep.subr.bf16.mxu1 %v903_v1  ;;  %776 = vmatprep.subr.bf16.mxu0 %v903_v1  ;;  %v801_v3 = vpack.c.bf16 %v332_v2, %v331_v63  ;;  %v334_v5 = vld [vmem:[#allocation2 + $0x138] sm:$0xff]  ;;  %v335_v7 = vld [vmem:[#allocation2 + $0x140] sm:$0xff]  ;;  %v336_v8 = vld [vmem:[#allocation2 + $0x148] sm:$0xff] }
  0x35   :  { %v804_v6 = vpack.c.bf16 %v334_v5, %v333_v4  ;;  %v807_v9 = vpack.c.bf16 %v336_v8, %v335_v7  ;;  %v337_v10 = vld [vmem:[#allocation2 + $0x150] sm:$0xff]  ;;  %v338_v11 = vld [vmem:[#allocation2 + $0x158] sm:$0xff]  ;;  %v339_v13 = vld [vmem:[#allocation2 + $0x160] sm:$0xff] }
  0x36   :  { %v810_v12 = vpack.c.bf16 %v338_v11, %v337_v10  ;;  %v340_v14 = vld [vmem:[#allocation2 + $0x168] sm:$0xff]  ;;  %v525_v16 = vld [vmem:[%s1035_s3 + $0x1] ss:$0 sm:$0xff]  ;;  %v342_v22 = vld [vmem:[#allocation2 + $0x178] sm:$0xff] }
  0x37   :  { %757 = vmatpush3.bf16.msra.mxu1 %v756_v15  ;;  %778 = vmatpush3.bf16.msra.mxu0 %v777_v36  ;;  %v813_v15 = vpack.c.bf16 %v340_v14, %v339_v13  ;;  %v423_v25 = vld [vmem:[#allocation4 + $0x8] sm:$0xff]  ;;  %v424_v26 = vld [vmem:[#allocation4 + $0x10] sm:$0xff]  ;;  %v425_v28 = vld [vmem:[#allocation4 + $0x18] sm:$0xff] }
  0x38   :  { %758 = vmatprep.subr.bf16.mxu1 %v903_v1  ;;  %779 = vmatprep.subr.bf16.mxu0 %v903_v1  ;;  %v822_v29 = vpack.c.bf16 %v425_v28, %v424_v26  ;;  %v426_v30 = vld [vmem:[#allocation4 + $0x20] sm:$0xff]  ;;  %v427_v31 = vld [vmem:[#allocation4 + $0x28] sm:$0xff]  ;;  %v429_v33 = vld [vmem:[#allocation4 + $0x38] sm:$0xff] }
  0x39   :  { %v825_v32 = vpack.c.bf16 %v427_v31, %v426_v30  ;;  %v430_v35 = vld [vmem:[#allocation4 + $0x40] sm:$0xff]  ;;  %v431_v36 = vld [vmem:[#allocation4 + $0x48] sm:$0xff]  ;;  %v432_v38 = vld [vmem:[#allocation4 + $0x50] sm:$0xff] }
  0x3a   :  { %v831_v37 = vpack.c.bf16 %v431_v36, %v430_v35  ;;  %v434_v41 = vld [vmem:[#allocation4 + $0x60] sm:$0xff] }
  0x3b   :  { %760 = vmatpush3.bf16.msra.mxu1 %v759_v18  ;;  %781 = vmatpush3.bf16.msra.mxu0 %v780_v39  ;;  %v433_v39 = vld [vmem:[#allocation4 + $0x58] sm:$0xff]  ;;  %v527_v44 = vld [vmem:[%s1035_s3 + $0x2] ss:$0 sm:$0xff] }
  0x3c   :  { %761 = vmatprep.subr.bf16.mxu1 %v903_v1  ;;  %782 = vmatprep.subr.bf16.mxu0 %v903_v1  ;;  %v834_v40 = vpack.c.bf16 %v433_v39, %v432_v38 }
  0x3f   :  { %763 = vmatpush3.bf16.msra.mxu1 %v762_v21  ;;  %784 = vmatpush3.bf16.msra.mxu0 %v783_v42  ;;  %v341_v21 = vld [vmem:[#allocation2 + $0x170] sm:$0xff]  ;;  %v435_v42 = vld [vmem:[#allocation4 + $0x68] sm:$0xff] }
  0x40   :  { %764 = vmatprep.subr.bf16.mxu1 %v903_v1  ;;  %785 = vmatprep.subr.bf16.mxu0 %v903_v1  ;;  %v816_v23 = vpack.c.bf16 %v342_v22, %v341_v21  ;;  %v837_v43 = vpack.c.bf16 %v435_v42, %v434_v41 }
  0x43   :  { %766 = vmatpush3.bf16.msra.mxu1 %v765_v24  ;;  %787 = vmatpush3.bf16.msra.mxu0 %v786_v45  ;;  %v422_v24 = vld [vmem:[#allocation4] sm:$0xff] }
  0x44   :  { %767 = vmatprep.subr.bf16.mxu1 %v903_v1  ;;  %788 = vmatprep.subr.bf16.mxu0 %v903_v1 }
  0x47   :  { %769 = vmatpush3.bf16.msra.mxu1 %v768_v27  ;;  %790 = vmatpush3.bf16.msra.mxu0 %v789_v48  ;;  %v819_v27 = vpack.c.bf16 %v423_v25, %v422_v24 }
  0x48   :  { %794 = vmatprep.subr.bf16.mxu1 %v903_v1  ;;  %791 = vmatprep.subr.bf16.mxu0 %v903_v1 }
  0x4b   :  { %793 = vmatpush3.bf16.msra.mxu0 %v792_v56  ;;  %v530_v56 = vld [vmem:[%s1037_s5] ss:$0 sm:$0xff] }
  0x4c   :  { %818 = vmatprep.subr.bf16.mxu0 %v903_v1 }
  0xfc   :  { %v130_v50 = vpop.f32.mrb[0].mxu0 }
  0xfd   :  { %v131_v51 = vadd.f32 %v522_v49, %v130_v50  ;;  %v605_v52 = vpop.f32.mrb[1].mxu0  ;;  %v436_v49 = vld [vmem:[#allocation4 + $0x70] sm:$0xff]  ;;  %v437_v50 = vld [vmem:[#allocation4 + $0x78] sm:$0xff] }
  0xfe   :  { %v529_v52 = vld [vmem:[%s1035_s3 + $0x3] ss:$0 sm:$0xff] }
  0xff   :  { %v134_v53 = vmax.f32 %v131_v51, 0.0  ;;  %v840_v51 = vpack.c.bf16 %v437_v50, %v436_v49 }
 0x101   :  { %639 = vmatmul.mubr.f32.vlgmr.msra.gmra.mrb[0].mxu1 %v134_v53 }
 0x102   :  { %708 = vmatprep.mubr.msk.f32.mxu1 %vm902_vm0, %v901_v0  ;;  %796 = vmatpush3.bf16.msra.mxu1 %v795_v60 }
 0x103   :  { %797 = vmatprep.subr.bf16.mxu1 %v903_v1 }
 0x106   :  { %799 = vmatpush3.bf16.msra.mxu1 %v798_v62 }
 0x107   :  { %800 = vmatprep.subr.bf16.mxu1 %v903_v1 }
 0x10a   :  { %802 = vmatpush3.bf16.msra.mxu1 %v801_v3 }
 0x10b   :  { %803 = vmatprep.subr.bf16.mxu1 %v903_v1 }
 0x10e   :  { %805 = vmatpush3.bf16.msra.mxu1 %v804_v6 }
 0x10f   :  { %806 = vmatprep.subr.bf16.mxu1 %v903_v1 }
 0x112   :  { %808 = vmatpush3.bf16.msra.mxu1 %v807_v9 }
 0x113   :  { %809 = vmatprep.subr.bf16.mxu1 %v903_v1 }
 0x116   :  { %811 = vmatpush3.bf16.msra.mxu1 %v810_v12 }
 0x117   :  { %812 = vmatprep.subr.bf16.mxu1 %v903_v1 }
 0x11a   :  { %814 = vmatpush3.bf16.msra.mxu1 %v813_v15 }
 0x11b   :  { %815 = vmatprep.subr.bf16.mxu1 %v903_v1 }
 0x11e   :  { %817 = vmatpush3.bf16.msra.mxu1 %v816_v23 }
 0x1d4   :  { %v225_v17 = vpop.f32.mrb[0].mxu1 }
 0x1d5   :  { %v226_v18 = vadd.f32 %v525_v16, %v225_v17  ;;  %v640_v19 = vpop.f32.mrb[1].mxu1 }
 0x1d7   :  { %v229_v20 = vmax.f32 %v226_v18, 0.0 }
 0x1d9   :  { %674 = vmatmul.mubr.f32.vlgmr.msra.gmra.mrb[2].mxu0 %v229_v20 }
 0x1da   :  { %743 = vmatprep.mubr.msk.f32.mxu0 %vm902_vm0, %v901_v0  ;;  %820 = vmatpush3.bf16.msra.mxu0 %v819_v27  ;;  %v428_v0 = vld [vmem:[#allocation4 + $0x30] sm:$0xff] }
 0x1db   :  { %821 = vmatprep.subr.bf16.mxu0 %v903_v1  ;;  %v828_v34 = vpack.c.bf16 %v429_v33, %v428_v0 }
 0x1de   :  { %823 = vmatpush3.bf16.msra.mxu0 %v822_v29 }
 0x1df   :  { %824 = vmatprep.subr.bf16.mxu0 %v903_v1 }
 0x1e2   :  { %826 = vmatpush3.bf16.msra.mxu0 %v825_v32 }
 0x1e3   :  { %827 = vmatprep.subr.bf16.mxu0 %v903_v1 }
 0x1e6   :  { %829 = vmatpush3.bf16.msra.mxu0 %v828_v34 }
 0x1e7   :  { %830 = vmatprep.subr.bf16.mxu0 %v903_v1 }
 0x1ea   :  { %832 = vmatpush3.bf16.msra.mxu0 %v831_v37 }
 0x1eb   :  { %833 = vmatprep.subr.bf16.mxu0 %v903_v1 }
 0x1ee   :  { %835 = vmatpush3.bf16.msra.mxu0 %v834_v40 }
 0x1ef   :  { %836 = vmatprep.subr.bf16.mxu0 %v903_v1 }
 0x1f2   :  { %838 = vmatpush3.bf16.msra.mxu0 %v837_v43 }
 0x1f3   :  { %839 = vmatprep.subr.bf16.mxu0 %v903_v1 }
 0x1f6   :  { %841 = vmatpush3.bf16.msra.mxu0 %v840_v51 }
 0x2ac   :  { %v321_v45 = vpop.f32.mrb[2].mxu0 }
 0x2ad   :  { %v322_v46 = vadd.f32 %v527_v44, %v321_v45  ;;  %v675_v47 = vpop.f32.mrb[3].mxu0 }
 0x2af   :  { %v325_v48 = vmax.f32 %v322_v46, 0.0 }
 0x2b1   :  { %709 = vmatmul.mubr.f32.vlgmr.msra.gmra.mrb[2].mxu1 %v325_v48 }
 0x384   :  { %v417_v53 = vpop.f32.mrb[2].mxu1 }
 0x385   :  { %v418_v54 = vadd.f32 %v529_v52, %v417_v53  ;;  %v710_v1 = vpop.f32.mrb[3].mxu1 }
 0x387   :  { %v421_v55 = vmax.f32 %v418_v54, 0.0 }
 0x389   :  { %744 = vmatmul.mubr.f32.vlgmr.msra.gmra.mrb[4].mxu0 %v421_v55 }
 0x45c   :  { %v511_v57 = vpop.f32.mrb[4].mxu0 }
 0x45d   :  { %v512_v58 = vadd.f32 %v530_v56, %v511_v57  ;;  %v745_v59 = vpop.f32.mrb[5].mxu0 }
 0x45f   :  { %515 = vst.msk [vmem:[%s1038_s6] sm:$0xff] %vm60_vm1, %v512_v58 }
 0x460   :  { %520 = vsyncpa [#allocation3], 1 }
 0x461   :  { %521 = vsyncpa [#allocation5], 1 }

</bundles_post_ra>
